<compile_context>
chip_gen: v7x
topology: tpu7x:2x2x1
jax: 0.10.0
libtpu: 0.0.40
codegen_flags: <defaults>
</compile_context>

<pallas_src>
import functools

import jax
import jax.numpy as jnp
from jax.experimental import pallas as pl
from jax.experimental.pallas import tpu as pltpu


def _round_up(a: int, m: int) -> int:
    return (a + m - 1) // m * m


def _pad2d(a, rows: int, cols: int):
    pr, pc = rows - a.shape[0], cols - a.shape[1]
    if pr or pc:
        a = jnp.pad(a, ((0, pr), (0, pc)))
    return a


def _patch_embed_kernel(x_ref, w_ref, b_ref, o_ref):
    # x_ref: (tm, K_pad)     bf16 patches (streamed over M)
    # w_ref: (K_pad, E_pad)  bf16 projection weight (VMEM-resident)
    # b_ref: (1, E_pad)      f32 bias (VMEM-resident)
    # o_ref: (tm, E_pad)     output tile
    acc = jnp.dot(x_ref[...], w_ref[...], preferred_element_type=jnp.float32)
    o_ref[...] = (acc + b_ref[...]).astype(o_ref.dtype)


@functools.partial(jax.jit, static_argnames=("patch_size", "out_dtype"))
def patch_embed(x, weight, bias, patch_size, out_dtype=None):
    """x: (B, C, H, W) float32 (NCHW, like PyTorch).
    weight: (E, C, p, p) conv weight (PyTorch layout).
    bias:   (E,) conv bias.
    Returns (B, N, E) with N = (H//p)*(W//p)  ==  proj(x).flatten(2).transpose(1, 2).
    """
    B, C, H, W = x.shape
    E = weight.shape[0]
    p = patch_size
    assert H % p == 0 and W % p == 0
    nh, nw = H // p, W // p
    N = nh * nw
    M = B * N
    K = C * p * p

    out_dtype = x.dtype if out_dtype is None else jnp.dtype(out_dtype)
    out_itemsize = jnp.dtype(out_dtype).itemsize

    # ---- Patch extraction in bf16: (B,C,H,W) -> (M, K), K ordered (C,ph,pw). --
    # Cast first so the XLA transpose/pad pass moves half the bytes.
    xb = x.astype(jnp.bfloat16)
    xp = xb.reshape(B, C, nh, p, nw, p)
    xp = jnp.transpose(xp, (0, 2, 4, 1, 3, 5)).reshape(M, K)

    w2d = weight.reshape(E, K).T.astype(jnp.bfloat16)   # (K, E)

    # ---- Lane / sublane aligned padding. ----
    K_pad = _round_up(K, 128)
    E_pad = _round_up(E, 128)

    # Row tile: as large as a conservative VMEM budget allows (resident
    # weight + double-buffered x/out), capped at 1024 so it also fits v7x's
    # 64 MiB/TC VMEM.
    VMEM_BUDGET = 40 * 1024 * 1024

    def _footprint(tm_):
        return (2 * tm_ * K_pad * 2                 # x tile (bf16), double-buffered
                + 2 * tm_ * E_pad * out_itemsize    # out tile, double-buffered
                + 2 * K_pad * E_pad * 2             # resident weight (2x alloc)
                + 2 * E_pad * 4)                    # bias

    tm = 1024
    while tm > 128 and _footprint(tm) > VMEM_BUDGET:
        tm //= 2

    if M <= tm:
        # bf16 packs 16 rows per vreg -> round to 16, not 8.
        tm = max(_round_up(M, 16), 16)
    M_pad = _round_up(M, tm)

    xp_p = _pad2d(xp, M_pad, K_pad)                       # bf16
    w_p = _pad2d(w2d, K_pad, E_pad)                       # bf16
    b_p = _pad2d(bias.reshape(1, E).astype(jnp.float32), 1, E_pad)

    grid = (M_pad // tm,)

    # Bytes now reflect the real DMA pattern: x once, weight once, out once.
    cost = pl.CostEstimate(
        flops=2 * M_pad * K_pad * E_pad,
        transcendentals=0,
        bytes_accessed=(M_pad * K_pad * 2 + K_pad * E_pad * 2
                        + E_pad * 4 + M_pad * E_pad * out_itemsize),
    )

    vmem_limit = max(_footprint(tm) + (4 << 20), 32 << 20)

    out = pl.pallas_call(
        _patch_embed_kernel,
        out_shape=jax.ShapeDtypeStruct((M_pad, E_pad), out_dtype),
        grid=grid,
        in_specs=[
            pl.BlockSpec((tm, K_pad), lambda i: (i, 0)),       # streamed x
            pl.BlockSpec((K_pad, E_pad), lambda i: (0, 0)),    # resident weight
            pl.BlockSpec((1, E_pad), lambda i: (0, 0)),        # resident bias
        ],
        out_specs=pl.BlockSpec((tm, E_pad), lambda i: (i, 0)),
        compiler_params=pltpu.CompilerParams(
            dimension_semantics=("parallel",),
            vmem_limit_bytes=vmem_limit,
            # Let XLA fuse the patch transpose/cast/pad into the input DMA
            # instead of materializing xp in HBM (biggest win on v5e/v6e).
            allow_input_fusion=[True, False, False],
        ),
        cost_estimate=cost,
    )(xp_p, w_p, b_p)

    return out[:M, :E].reshape(B, N, E)


def _reference_conv(x, weight, bias, patch_size):
    # Pure-JAX f32 reference via lax.conv (the exact module semantics).
    out = jax.lax.conv_general_dilated(
        x, weight,
        window_strides=(patch_size, patch_size),
        padding="VALID",
        dimension_numbers=("NCHW", "OIHW", "NCHW"),
    ) + bias[None, :, None, None]
    B, E, nh, nw = out.shape
    return jnp.transpose(out.reshape(B, E, nh * nw), (0, 2, 1))


def _reference_bf16_matmul(x, weight, bias, patch_size):
    # Same math as the kernel (bf16 inputs, f32 accumulation) for a tight check.
    B, C, H, W = x.shape
    E = weight.shape[0]
    p = patch_size
    nh, nw = H // p, W // p
    N = nh * nw
    K = C * p * p
    xp = jnp.transpose(x.reshape(B, C, nh, p, nw, p),
                       (0, 2, 4, 1, 3, 5)).reshape(B * N, K)
    xb = xp.astype(jnp.bfloat16).astype(jnp.float32)
    wb = weight.reshape(E, K).T.astype(jnp.bfloat16).astype(jnp.float32)
    out = jnp.dot(xb, wb) + bias[None, :]
    return out.reshape(B, N, E)


if __name__ == "__main__":
    # Small shapes consistent with the module's forward.
    B, C, H, W = 2, 4, 16, 16
    patch_size = 8
    embed_dim = 32

    key = jax.random.PRNGKey(0)
    kx, kw, kb = jax.random.split(key, 3)

    x = jax.random.normal(kx, (B, C, H, W), dtype=jnp.float32)
    # Deterministic parameter init (shapes from nn.Conv2d(C, E, p, stride=p)).
    weight = jax.random.normal(kw, (embed_dim, C, patch_size, patch_size),
                               dtype=jnp.float32) * 0.02
    bias = jax.random.normal(kb, (embed_dim,), dtype=jnp.float32) * 0.02

    out = patch_embed(x, weight, bias, patch_size)
    out = jax.block_until_ready(out)

    N = (H // patch_size) * (W // patch_size)
    assert out.shape == (B, N, embed_dim)

    # Tight check against a bf16-input / f32-accum matmul (same math as kernel).
    ref_tight = _reference_bf16_matmul(x, weight, bias, patch_size)
    assert jnp.allclose(out, ref_tight, atol=2e-3, rtol=2e-3)

    # Semantic check against the full-f32 conv reference (bf16 rounding slack).
    # TODO(synk): expose a pure-f32 path for callers needing bit-level conv parity.
    ref_conv = _reference_conv(x, weight, bias, patch_size)
    assert jnp.allclose(out, ref_conv, atol=3e-2, rtol=3e-2)

    print("KERNEL_OK")
</pallas_src>

<mosaic_0001>
module attributes {stable_mosaic.version = 11 : i64} {
  func.func @_patch_embed_kernel(%arg0: i32, %arg1: memref<16x256xbf16, #tpu.memory_space<vmem>>, %arg2: memref<256x128xbf16, #tpu.memory_space<vmem>>, %arg3: memref<1x128xf32, #tpu.memory_space<vmem>>, %arg4: memref<16x128xf32, #tpu.memory_space<vmem>>) attributes {dimension_semantics = [#tpu.dimension_semantics<parallel>], iteration_bounds = array<i64: 1>, scalar_prefetch = 0 : i64, scratch_operands = 0 : i64, tpu.core_type = #tpu.core_type<tc>, window_params = [{transform_indices = @transform_0, window_bounds = array<i64: 16, 256>}, {pipeline_mode = #tpu.pipeline_mode<synchronous>, transform_indices = @transform_1, window_bounds = array<i64: 256, 128>}, {pipeline_mode = #tpu.pipeline_mode<synchronous>, transform_indices = @transform_2, window_bounds = array<i64: 1, 128>}, {transform_indices = @transform_3, window_bounds = array<i64: 16, 128>}]} {
    %c0 = arith.constant 0 : index
    %c0_0 = arith.constant 0 : index
    %0 = vector.load %arg1[%c0, %c0_0] : memref<16x256xbf16, #tpu.memory_space<vmem>>, vector<16x256xbf16>
    %c0_1 = arith.constant 0 : index
    %c0_2 = arith.constant 0 : index
    %1 = vector.load %arg2[%c0_1, %c0_2] : memref<256x128xbf16, #tpu.memory_space<vmem>>, vector<256x128xbf16>
    %cst = arith.constant dense<0.000000e+00> : vector<16x128xf32>
    %2 = tpu.matmul %0, %1, %cst {dimension_numbers = #tpu.dot_dimension_numbers<[1], [0], [0], [1], [0, 0, 1, 1], [], []>} : vector<16x256xbf16>, vector<256x128xbf16>, vector<16x128xf32> -> vector<16x128xf32>
    %c0_3 = arith.constant 0 : index
    %c0_4 = arith.constant 0 : index
    %3 = vector.load %arg3[%c0_3, %c0_4] : memref<1x128xf32, #tpu.memory_space<vmem>>, vector<1x128xf32>
    %4 = vector.broadcast %3 : vector<1x128xf32> to vector<16x128xf32>
    %5 = arith.addf %2, %4 : vector<16x128xf32>
    %c0_5 = arith.constant 0 : index
    %c0_6 = arith.constant 0 : index
    %6 = vector.load %arg4[%c0_5, %c0_6] : memref<16x128xf32, #tpu.memory_space<vmem>>, vector<16x128xf32>
    tpu.vector_store %arg4[%c0_5, %c0_6], %5 {strides = array<i32>} : memref<16x128xf32, #tpu.memory_space<vmem>>, vector<16x128xf32>,
    return
  }
  func.func @transform_0(%arg0: i32) -> (i32, i32) {
    %c0_i32 = arith.constant 0 : i32
    %c0_i32_0 = arith.constant 0 : i32
    return %arg0, %c0_i32 : i32, i32
  }
  func.func @transform_1(%arg0: i32) -> (i32, i32) {
    %c0_i32 = arith.constant 0 : i32
    %c0_i32_0 = arith.constant 0 : i32
    %c0_i32_1 = arith.constant 0 : i32
    return %c0_i32, %c0_i32_0 : i32, i32
  }
  func.func @transform_2(%arg0: i32) -> (i32, i32) {
    %c0_i32 = arith.constant 0 : i32
    %c0_i32_0 = arith.constant 0 : i32
    %c0_i32_1 = arith.constant 0 : i32
    return %c0_i32, %c0_i32_0 : i32, i32
  }
  func.func @transform_3(%arg0: i32) -> (i32, i32) {
    %c0_i32 = arith.constant 0 : i32
    %c0_i32_0 = arith.constant 0 : i32
    return %arg0, %c0_i32 : i32, i32
  }
}

</mosaic_0001>

<bundles_post_ra>
// kernel: patch_embed.2
= control target key start
LH: loop header
LB: loop body
LE: loop exit
PB: predicated region body
PF: predicated region fallthrough
CT: control target
= control target key end

     0   :  { %s406_s0 = inlined_call_operand.vmem [shape: bf16[256,128], index: 0, kind: input, shape index: {}]   ;;  %s407_s1 = inlined_call_operand.vmem [shape: f32[1,128], index: 1, kind: input, shape index: {}]   ;;  %s408_s2 = inlined_call_operand.vmem [shape: bf16[8,256], index: 2, kind: input, shape index: {}]   ;;  %s409_s3 = inlined_call_operand.<no memory space> [shape: bf16[], index: 3, kind: input, shape index: {}]   ;;  %s410_s4 = inlined_call_operand.vmem [shape: f32[16,128], index: 4, kind: output, shape index: {}]  }
   0x1   :  { %v9_v0 = vstv %s409_s3 }
   0x2   :  { %v10_v1 = vunpack.i.l.bf16 %v9_v0 }
   0x3   :  { %v302_v2 = vld [vmem:[%s406_s0 + $0x40] sm:$0xff]   ;;  %v304_v5 = vld [vmem:[%s406_s0 + $0x48] sm:$0xff]   ;;  %v306_v7 = vld [vmem:[%s406_s0 + $0x50] sm:$0xff]  }
   0x4   :  { %v278_v3 = vpack.c.bf16 %v10_v1, %v10_v1  ;;  %v303_v4 = vld [vmem:[%s406_s0] sm:$0xff]   ;;  %280 = vmatprep.subr.bf16.mxu0 %v302_v2  ;;  %v305_v6 = vld [vmem:[%s406_s0 + $0x8] sm:$0xff]   ;;  %v307_v8 = vld [vmem:[%s406_s0 + $0x10] sm:$0xff]  }
   0x5   :  { %281 = vmatpush3.bf16.msra.mxu0 %v303_v4  ;;  %v308_v9 = vld [vmem:[%s406_s0 + $0x58] sm:$0xff]   ;;  %v310_v11 = vld [vmem:[%s406_s0 + $0x60] sm:$0xff]   ;;  %v312_v13 = vld [vmem:[%s406_s0 + $0x68] sm:$0xff]  }
   0x6   :  { %282 = vmatprep.subr.bf16.mxu0 %v304_v5  ;;  %v309_v10 = vld [vmem:[%s406_s0 + $0x18] sm:$0xff]   ;;  %v311_v12 = vld [vmem:[%s406_s0 + $0x20] sm:$0xff]   ;;  %v313_v15 = vld [vmem:[%s406_s0 + $0x28] sm:$0xff]  }
   0x7   :  { %v29_v14 = vld [vmem:[%s408_s2] sm:$0xff]   ;;  %v314_v16 = vld [vmem:[%s406_s0 + $0x70] sm:$0xff]   ;;  %v316_v18 = vld [vmem:[%s406_s0 + $0x78] sm:$0xff]  }
   0x8   :  { %34 = vst [vmem:[#allocation7] sm:$0xff] %v29_v14   ;;  %v315_v17 = vld [vmem:[%s406_s0 + $0x30] sm:$0xff]   ;;  %v317_v21 = vld [vmem:[%s406_s0 + $0x38] sm:$0xff]   ;;  %v256_v24 = vld [vmem:[%s407_s1] ss:$0 sm:$0xff] }
   0x9   :  { %283 = vmatpush3.bf16.msra.mxu0 %v305_v6 }
   0xa   :  { %284 = vmatprep.subr.bf16.mxu0 %v306_v7 }
   0xd   :  { %285 = vmatpush3.bf16.msra.mxu0 %v307_v8 }
   0xe   :  { %286 = vmatprep.subr.bf16.mxu0 %v308_v9 }
   0xf   :  { %v61_v19 = vld [vmem:[#allocation7] sm:$0xff] }
  0x10   :  { %v258_v20 = vcombine.high %v61_v19, %v278_v3  ;;  %v257_v22 = vcombine.low %v61_v19, %v278_v3 }
  0x11   :  { %287 = vmatpush3.bf16.msra.mxu0 %v309_v10 }
  0x12   :  { %288 = vmatprep.subr.bf16.mxu0 %v310_v11  ;;  %240 = vmatprep.mubr.bf16.mxu0 %v258_v20 }
  0x15   :  { %289 = vmatpush3.bf16.msra.mxu0 %v311_v12 }
  0x16   :  { %290 = vmatprep.subr.bf16.mxu0 %v312_v13 }
  0x19   :  { %291 = vmatpush3.bf16.msra.mxu0 %v313_v15 }
  0x1a   :  { %292 = vmatprep.subr.bf16.mxu0 %v314_v16 }
  0x1d   :  { %293 = vmatpush3.bf16.msra.mxu0 %v315_v17 }
  0x1e   :  { %294 = vmatprep.subr.bf16.mxu0 %v316_v18 }
  0x21   :  { %295 = vmatpush3.bf16.msra.mxu0 %v317_v21 }
  0x24   :  { %241 = vmatmul.mubr.bf16.vlgmr.msra.gmra.mrb[0].mxu0 %v257_v22 }
  0xf7   :  { %v296_v23 = vpop.f32.mrb[0].mxu0 }
  0xf8   :  { %v297_v25 = vpop.f32.mrb[1].mxu0 }
  0xf9   :  { %v298_v26 = vadd.f32 %v297_v25, %v296_v23  ;;  %v299_v27 = vpop.f32.mrb[2].mxu0 }
  0xfa   :  { %v300_v28 = vpop.f32.mrb[3].mxu0 }
  0xfb   :  { %v243_v29 = vadd.f32 %v298_v26, %v256_v24  ;;  %v301_v30 = vadd.f32 %v300_v28, %v299_v27 }
  0xfd   :  { %249 = vst [vmem:[%s410_s4] sm:$0xff] %v243_v29  ;;  %v246_v31 = vadd.f32 %v301_v30, %v256_v24 }
  0xff   :  { %250 = vst [vmem:[%s410_s4 + $0x8] sm:$0xff] %v246_v31 }

</bundles_post_ra>
